<compile_context>
chip_gen: v7x
topology: tpu7x:2x2x1
jax: 0.10.0
libtpu: 0.0.40
codegen_flags: <defaults>
</compile_context>

<pallas_src>
import functools

import jax
import jax.numpy as jnp
from jax.experimental import pallas as pl
from jax.experimental.pallas import tpu as pltpu


def _continuity_dicebce_kernel(*refs, smooth, lambda_smooth, n_elems, n_diffs,
                               has_weight):
    if has_weight:
        (x_ref, t_ref, w_ref, out_ref,
         bce_acc, inter_acc, denom_acc, cont_acc, carry_ref) = refs
    else:
        (x_ref, t_ref, out_ref,
         bce_acc, inter_acc, denom_acc, cont_acc, carry_ref) = refs
        w_ref = None

    k = pl.program_id(0)
    last = pl.num_programs(0) - 1

    @pl.when(k == 0)
    def _init():
        bce_acc[...] = jnp.zeros_like(bce_acc)
        inter_acc[...] = jnp.zeros_like(inter_acc)
        denom_acc[...] = jnp.zeros_like(denom_acc)
        cont_acc[...] = jnp.zeros_like(cont_acc)

    x = x_ref[...].astype(jnp.float32)
    t = t_ref[...].astype(jnp.float32)
    lt = x.shape[1]

    # Single transcendental pair shared by BCE and sigmoid.
    e = jnp.exp(-jnp.abs(x))                      # exp(-|x|)
    log_term = jnp.log1p(e)

    # Stable BCE-with-logits: max(x,0) - x*t + log1p(exp(-|x|))
    bce_elem = jnp.maximum(x, 0.0) - x * t + log_term
    if has_weight:
        bce_elem = bce_elem * w_ref[...].astype(jnp.float32)

    # sigmoid(x) rebuilt from e (exact reciprocal: feeds the dice ratio).
    r = 1.0 / (1.0 + e)
    sig = jnp.where(x >= 0.0, r, e * r)

    # Per-lane accumulation (pure VPU adds); XLU reductions deferred to finalize.
    bce_acc[...] += bce_elem
    inter_acc[...] += sig * t
    denom_acc[...] += sig + t

    # Temporal continuity: in-tile neighbour differences ...
    if lt > 1:
        cont_acc[:, : lt - 1] += jnp.abs(x[:, 1:] - x[:, :-1])

    # ... plus the difference straddling the previous tile boundary.
    @pl.when(k > 0)
    def _cross_tile():
        cont_acc[:, 0:1] += jnp.abs(x[:, 0:1] - carry_ref[...])

    # Carry this tile's last column for the next grid step (grid is sequential).
    carry_ref[...] = x[:, lt - 1:lt]

    @pl.when(k == last)
    def _finalize():
        bce = jnp.sum(bce_acc[...]) * (1.0 / n_elems)
        inter = jnp.sum(inter_acc[...])
        denom = jnp.sum(denom_acc[...])
        dice = 1.0 - (2.0 * inter + smooth) / (denom + smooth)
        cont = jnp.sum(cont_acc[...]) * (1.0 / n_diffs)
        out_ref[0, 0] = bce + dice + lambda_smooth * cont


def _choose_tile_l(L, max_tile_l):
    """Largest multiple of 128 that divides L and is <= max_tile_l."""
    if L % 128 != 0 or L <= max_tile_l:
        # TODO(synk): ragged L falls back to a single whole-array block.
        return L
    best = 128
    t = 128
    while t <= max_tile_l:
        if L % t == 0:
            best = t
        t += 128
    return best


def continuity_loss(inputs, targets, weight=None, *, smooth=1.0,
                    lambda_smooth=0.1, max_tile_l=2048):
    """JAX/Pallas equivalent of ContinuityLoss.forward (returns scalar f32)."""
    # squeeze (B, 1, L) -> (B, L), like the PyTorch module does
    if inputs.ndim == 3 and inputs.shape[1] == 1:
        inputs = inputs[:, 0, :]
    B, L = inputs.shape
    # targets.view_as(inputs) semantics (cast to f32 happens inside the kernel)
    targets = jnp.reshape(targets, inputs.shape)

    has_weight = weight is not None
    if has_weight:
        weight = jnp.broadcast_to(weight, inputs.shape)

    lt = _choose_tile_l(L, max_tile_l)
    grid = (L // lt,)

    kernel = functools.partial(
        _continuity_dicebce_kernel,
        smooth=float(smooth),
        lambda_smooth=float(lambda_smooth),
        n_elems=B * L,
        n_diffs=max(B * (L - 1), 1),
        has_weight=has_weight,
    )

    block = lambda k: (0, k)
    in_specs = [pl.BlockSpec((B, lt), block), pl.BlockSpec((B, lt), block)]
    operands = [inputs, targets]
    bytes_accessed = (inputs.size * inputs.dtype.itemsize
                      + targets.size * targets.dtype.itemsize + 4)
    if has_weight:
        in_specs.append(pl.BlockSpec((B, lt), block))
        operands.append(weight)
        bytes_accessed += weight.size * weight.dtype.itemsize

    out = pl.pallas_call(
        kernel,
        out_shape=jax.ShapeDtypeStruct((1, 1), jnp.float32),
        grid_spec=pltpu.PrefetchScalarGridSpec(
            num_scalar_prefetch=0,
            grid=grid,
            in_specs=in_specs,
            out_specs=pl.BlockSpec(memory_space=pltpu.SMEM),
            scratch_shapes=[pltpu.VMEM((B, lt), jnp.float32)] * 4    # bce/inter/denom/cont
                           + [pltpu.VMEM((B, 1), jnp.float32)],      # boundary carry
        ),
        compiler_params=pltpu.CompilerParams(
            dimension_semantics=("arbitrary",),
            vmem_limit_bytes=64 * 1024 * 1024,
        ),
        cost_estimate=pl.CostEstimate(
            flops=12 * B * L,
            transcendentals=2 * B * L,
            bytes_accessed=int(bytes_accessed),
        ),
    )(*operands)
    return out[0, 0]


def _reference(inputs, targets, weight=None, smooth=1.0, lambda_smooth=0.1):
    """Pure-JAX reference for sanity checking."""
    if inputs.ndim == 3 and inputs.shape[1] == 1:
        inputs = inputs[:, 0, :]
    x = inputs.astype(jnp.float32)
    t = jnp.reshape(targets, x.shape).astype(jnp.float32)
    bce_elem = jnp.maximum(x, 0.0) - x * t + jnp.log1p(jnp.exp(-jnp.abs(x)))
    if weight is not None:
        bce_elem = bce_elem * weight.astype(jnp.float32)
    bce = jnp.mean(bce_elem)
    sig = jax.nn.sigmoid(x)
    inter = jnp.sum(sig * t)
    dice = 1.0 - (2.0 * inter + smooth) / (jnp.sum(sig) + jnp.sum(t) + smooth)
    cont = jnp.mean(jnp.abs(x[:, 1:] - x[:, :-1]))
    return bce + dice + lambda_smooth * cont


if __name__ == "__main__":
    key = jax.random.PRNGKey(0)
    k1, k2, k3, k4 = jax.random.split(key, 4)

    # Case 1: (B, 1, L) f32 logits, unweighted, single tile.
    B, L = 2, 128
    inputs = jax.random.normal(k1, (B, 1, L), dtype=jnp.float32)
    targets = (jax.random.uniform(k2, (B, L)) > 0.5).astype(jnp.float32)
    loss = jax.block_until_ready(continuity_loss(inputs, targets))
    ref = _reference(inputs, targets)
    assert jnp.allclose(loss, ref, rtol=1e-5, atol=1e-5), (loss, ref)

    # Case 2: (B, L) f32 logits, weighted, multi-tile (exercises cross-tile carry).
    B2, L2 = 2, 512
    inputs2 = jax.random.normal(k3, (B2, L2), dtype=jnp.float32)
    targets2 = (jax.random.uniform(k4, (B2, L2)) > 0.5).astype(jnp.float32)
    weight2 = jax.random.uniform(k1, (B2, L2), dtype=jnp.float32) + 0.5
    loss2 = jax.block_until_ready(
        continuity_loss(inputs2, targets2, weight2, max_tile_l=128))
    ref2 = _reference(inputs2, targets2, weight2)
    assert jnp.allclose(loss2, ref2, rtol=1e-5, atol=1e-5), (loss2, ref2)

    # Case 3: bf16 logits streamed without wrapper upcast, unweighted, multi-tile.
    B3, L3 = 2, 256
    inputs3 = jax.random.normal(k2, (B3, L3), dtype=jnp.bfloat16)
    targets3 = (jax.random.uniform(k3, (B3, L3)) > 0.5).astype(jnp.float32)
    loss3 = jax.block_until_ready(
        continuity_loss(inputs3, targets3, max_tile_l=128))
    ref3 = _reference(inputs3, targets3)
    assert jnp.allclose(loss3, ref3, rtol=1e-5, atol=1e-5), (loss3, ref3)

    print("KERNEL_OK")
</pallas_src>

<mosaic_0001>
module attributes {stable_mosaic.version = 11 : i64} {
  func.func @_continuity_dicebce_kernel(%arg0: i32, %arg1: memref<2x128xf32, #tpu.memory_space<vmem>>, %arg2: memref<2x128xf32, #tpu.memory_space<vmem>>, %arg3: memref<1x1xf32, #tpu.memory_space<smem>>, %arg4: memref<2x128xf32, #tpu.memory_space<vmem>>, %arg5: memref<2x128xf32, #tpu.memory_space<vmem>>, %arg6: memref<2x128xf32, #tpu.memory_space<vmem>>, %arg7: memref<2x128xf32, #tpu.memory_space<vmem>>, %arg8: memref<2x1xf32, #tpu.memory_space<vmem>>) attributes {dimension_semantics = [#tpu.dimension_semantics<arbitrary>], iteration_bounds = array<i64: 1>, scalar_prefetch = 0 : i64, scratch_operands = 5 : i64, tpu.core_type = #tpu.core_type<tc>, window_params = [{transform_indices = @transform_0, window_bounds = array<i64: 2, 128>}, {transform_indices = @transform_1, window_bounds = array<i64: 2, 128>}, {transform_indices = @transform_2, window_bounds = array<i64: 1, 1>}]} {
    %c0_i32 = arith.constant 0 : i32
    %0 = arith.cmpi eq, %arg0, %c0_i32 : i32
    %1 = arith.extui %0 : i1 to i32
    %c0_i32_0 = arith.constant 0 : i32
    %2 = arith.cmpi ne, %1, %c0_i32_0 : i32
    scf.if %2 {
      %cst_30 = arith.constant 0.000000e+00 : f32
      %49 = vector.broadcast %cst_30 : f32 to vector<2x128xf32>
      %c0_31 = arith.constant 0 : index
      %c0_32 = arith.constant 0 : index
      %50 = vector.load %arg4[%c0_31, %c0_32] : memref<2x128xf32, #tpu.memory_space<vmem>>, vector<2x128xf32>
      tpu.vector_store %arg4[%c0_31, %c0_32], %49 {strides = array<i32>} : memref<2x128xf32, #tpu.memory_space<vmem>>, vector<2x128xf32>,
      %cst_33 = arith.constant 0.000000e+00 : f32
      %51 = vector.broadcast %cst_33 : f32 to vector<2x128xf32>
      %c0_34 = arith.constant 0 : index
      %c0_35 = arith.constant 0 : index
      %52 = vector.load %arg5[%c0_34, %c0_35] : memref<2x128xf32, #tpu.memory_space<vmem>>, vector<2x128xf32>
      tpu.vector_store %arg5[%c0_34, %c0_35], %51 {strides = array<i32>} : memref<2x128xf32, #tpu.memory_space<vmem>>, vector<2x128xf32>,
      %cst_36 = arith.constant 0.000000e+00 : f32
      %53 = vector.broadcast %cst_36 : f32 to vector<2x128xf32>
      %c0_37 = arith.constant 0 : index
      %c0_38 = arith.constant 0 : index
      %54 = vector.load %arg6[%c0_37, %c0_38] : memref<2x128xf32, #tpu.memory_space<vmem>>, vector<2x128xf32>
      tpu.vector_store %arg6[%c0_37, %c0_38], %53 {strides = array<i32>} : memref<2x128xf32, #tpu.memory_space<vmem>>, vector<2x128xf32>,
      %cst_39 = arith.constant 0.000000e+00 : f32
      %55 = vector.broadcast %cst_39 : f32 to vector<2x128xf32>
      %c0_40 = arith.constant 0 : index
      %c0_41 = arith.constant 0 : index
      %56 = vector.load %arg7[%c0_40, %c0_41] : memref<2x128xf32, #tpu.memory_space<vmem>>, vector<2x128xf32>
      tpu.vector_store %arg7[%c0_40, %c0_41], %55 {strides = array<i32>} : memref<2x128xf32, #tpu.memory_space<vmem>>, vector<2x128xf32>,
    } else {
    }
    %c0 = arith.constant 0 : index
    %c0_1 = arith.constant 0 : index
    %3 = vector.load %arg1[%c0, %c0_1] : memref<2x128xf32, #tpu.memory_space<vmem>>, vector<2x128xf32>
    %c0_2 = arith.constant 0 : index
    %c0_3 = arith.constant 0 : index
    %4 = vector.load %arg2[%c0_2, %c0_3] : memref<2x128xf32, #tpu.memory_space<vmem>>, vector<2x128xf32>
    %5 = math.absf %3 : vector<2x128xf32>
    %cst = arith.constant 0.000000e+00 : f32
    %6 = vector.broadcast %cst : f32 to vector<2x128xf32>
    %7 = arith.subf %6, %5 : vector<2x128xf32>
    %8 = math.exp %7 : vector<2x128xf32>
    %9 = math.log1p %8 : vector<2x128xf32>
    %cst_4 = arith.constant 0.000000e+00 : f32
    %10 = vector.broadcast %cst_4 : f32 to vector<2x128xf32>
    %11 = arith.maximumf %3, %10 : vector<2x128xf32>
    %12 = arith.mulf %3, %4 : vector<2x128xf32>
    %13 = arith.subf %11, %12 : vector<2x128xf32>
    %14 = arith.addf %13, %9 : vector<2x128xf32>
    %cst_5 = arith.constant 1.000000e+00 : f32
    %15 = vector.broadcast %cst_5 : f32 to vector<2x128xf32>
    %16 = arith.addf %15, %8 : vector<2x128xf32>
    %cst_6 = arith.constant 1.000000e+00 : f32
    %17 = vector.broadcast %cst_6 : f32 to vector<2x128xf32>
    %18 = arith.divf %17, %16 : vector<2x128xf32>
    %cst_7 = arith.constant 0.000000e+00 : f32
    %19 = vector.broadcast %cst_7 : f32 to vector<2x128xf32>
    %20 = arith.cmpf oge, %3, %19 : vector<2x128xf32>
    %21 = arith.mulf %8, %18 : vector<2x128xf32>
    %22 = arith.select %20, %18, %21 : vector<2x128xi1>, vector<2x128xf32>
    %c0_8 = arith.constant 0 : index
    %c0_9 = arith.constant 0 : index
    %23 = vector.load %arg4[%c0_8, %c0_9] : memref<2x128xf32, #tpu.memory_space<vmem>>, vector<2x128xf32>
    %24 = arith.addf %23, %14 : vector<2x128xf32>
    %c0_10 = arith.constant 0 : index
    %c0_11 = arith.constant 0 : index
    %25 = vector.load %arg4[%c0_10, %c0_11] : memref<2x128xf32, #tpu.memory_space<vmem>>, vector<2x128xf32>
    tpu.vector_store %arg4[%c0_10, %c0_11], %24 {strides = array<i32>} : memref<2x128xf32, #tpu.memory_space<vmem>>, vector<2x128xf32>,
    %c0_12 = arith.constant 0 : index
    %c0_13 = arith.constant 0 : index
    %26 = vector.load %arg5[%c0_12, %c0_13] : memref<2x128xf32, #tpu.memory_space<vmem>>, vector<2x128xf32>
    %27 = arith.mulf %22, %4 : vector<2x128xf32>
    %28 = arith.addf %26, %27 : vector<2x128xf32>
    %c0_14 = arith.constant 0 : index
    %c0_15 = arith.constant 0 : index
    %29 = vector.load %arg5[%c0_14, %c0_15] : memref<2x128xf32, #tpu.memory_space<vmem>>, vector<2x128xf32>
    tpu.vector_store %arg5[%c0_14, %c0_15], %28 {strides = array<i32>} : memref<2x128xf32, #tpu.memory_space<vmem>>, vector<2x128xf32>,
    %c0_16 = arith.constant 0 : index
    %c0_17 = arith.constant 0 : index
    %30 = vector.load %arg6[%c0_16, %c0_17] : memref<2x128xf32, #tpu.memory_space<vmem>>, vector<2x128xf32>
    %31 = arith.addf %22, %4 : vector<2x128xf32>
    %32 = arith.addf %30, %31 : vector<2x128xf32>
    %c0_18 = arith.constant 0 : index
    %c0_19 = arith.constant 0 : index
    %33 = vector.load %arg6[%c0_18, %c0_19] : memref<2x128xf32, #tpu.memory_space<vmem>>, vector<2x128xf32>
    tpu.vector_store %arg6[%c0_18, %c0_19], %32 {strides = array<i32>} : memref<2x128xf32, #tpu.memory_space<vmem>>, vector<2x128xf32>,
    %c0_20 = arith.constant 0 : index
    %c0_21 = arith.constant 0 : index
    %34 = vector.load %arg7[%c0_20, %c0_21] : memref<2x128xf32, #tpu.memory_space<vmem>>, vector<2x127xf32>
    %35 = vector.extract_strided_slice %3 {offsets = [0, 1], sizes = [2, 127], strides = [1, 1]} : vector<2x128xf32> to vector<2x127xf32>
    %36 = vector.extract_strided_slice %3 {offsets = [0, 0], sizes = [2, 127], strides = [1, 1]} : vector<2x128xf32> to vector<2x127xf32>
    %37 = arith.subf %35, %36 : vector<2x127xf32>
    %38 = math.absf %37 : vector<2x127xf32>
    %39 = arith.addf %34, %38 : vector<2x127xf32>
    %c0_22 = arith.constant 0 : index
    %c0_23 = arith.constant 0 : index
    %40 = vector.load %arg7[%c0_22, %c0_23] : memref<2x128xf32, #tpu.memory_space<vmem>>, vector<2x127xf32>
    tpu.vector_store %arg7[%c0_22, %c0_23], %39 {strides = array<i32>} : memref<2x128xf32, #tpu.memory_space<vmem>>, vector<2x127xf32>,
    %c0_i32_24 = arith.constant 0 : i32
    %41 = arith.cmpi sgt, %arg0, %c0_i32_24 : i32
    %42 = arith.extui %41 : i1 to i32
    %c0_i32_25 = arith.constant 0 : i32
    %43 = arith.cmpi ne, %42, %c0_i32_25 : i32
    scf.if %43 {
      %c0_30 = arith.constant 0 : index
      %c0_31 = arith.constant 0 : index
      %49 = vector.load %arg7[%c0_30, %c0_31] : memref<2x128xf32, #tpu.memory_space<vmem>>, vector<2x1xf32>
      %50 = vector.extract_strided_slice %3 {offsets = [0, 0], sizes = [2, 1], strides = [1, 1]} : vector<2x128xf32> to vector<2x1xf32>
      %c0_32 = arith.constant 0 : index
      %c0_33 = arith.constant 0 : index
      %51 = vector.load %arg8[%c0_32, %c0_33] : memref<2x1xf32, #tpu.memory_space<vmem>>, vector<2x1xf32>
      %52 = arith.subf %50, %51 : vector<2x1xf32>
      %53 = math.absf %52 : vector<2x1xf32>
      %54 = arith.addf %49, %53 : vector<2x1xf32>
      %c0_34 = arith.constant 0 : index
      %c0_35 = arith.constant 0 : index
      %55 = vector.load %arg7[%c0_34, %c0_35] : memref<2x128xf32, #tpu.memory_space<vmem>>, vector<2x1xf32>
      tpu.vector_store %arg7[%c0_34, %c0_35], %54 {strides = array<i32>} : memref<2x128xf32, #tpu.memory_space<vmem>>, vector<2x1xf32>,
    } else {
    }
    %44 = vector.extract_strided_slice %3 {offsets = [0, 127], sizes = [2, 1], strides = [1, 1]} : vector<2x128xf32> to vector<2x1xf32>
    %c0_26 = arith.constant 0 : index
    %c0_27 = arith.constant 0 : index
    %45 = vector.load %arg8[%c0_26, %c0_27] : memref<2x1xf32, #tpu.memory_space<vmem>>, vector<2x1xf32>
    tpu.vector_store %arg8[%c0_26, %c0_27], %44 {strides = array<i32>} : memref<2x1xf32, #tpu.memory_space<vmem>>, vector<2x1xf32>,
    %c0_i32_28 = arith.constant 0 : i32
    %46 = arith.cmpi eq, %arg0, %c0_i32_28 : i32
    %47 = arith.extui %46 : i1 to i32
    %c0_i32_29 = arith.constant 0 : i32
    %48 = arith.cmpi ne, %47, %c0_i32_29 : i32
    scf.if %48 {
      %c0_30 = arith.constant 0 : index
      %c0_31 = arith.constant 0 : index
      %49 = vector.load %arg4[%c0_30, %c0_31] : memref<2x128xf32, #tpu.memory_space<vmem>>, vector<2x128xf32>
      %50 = vector.shape_cast %49 : vector<2x128xf32> to vector<1x2x128xf32>
      %cst_32 = arith.constant dense<0.000000e+00> : vector<1xf32>
      %51 = vector.multi_reduction <add>, %50, %cst_32 [1, 2] : vector<1x2x128xf32> to vector<1xf32>
      %52 = vector.shape_cast %51 : vector<1xf32> to vector<1x1x1xf32>
      %53 = vector.extract %52[0, 0, 0] : f32 from vector<1x1x1xf32>
      %cst_33 = arith.constant 3.906250e-03 : f32
      %54 = arith.mulf %53, %cst_33 : f32
      %c0_34 = arith.constant 0 : index
      %c0_35 = arith.constant 0 : index
      %55 = vector.load %arg5[%c0_34, %c0_35] : memref<2x128xf32, #tpu.memory_space<vmem>>, vector<2x128xf32>
      %56 = vector.shape_cast %55 : vector<2x128xf32> to vector<1x2x128xf32>
      %cst_36 = arith.constant dense<0.000000e+00> : vector<1xf32>
      %57 = vector.multi_reduction <add>, %56, %cst_36 [1, 2] : vector<1x2x128xf32> to vector<1xf32>
      %58 = vector.shape_cast %57 : vector<1xf32> to vector<1x1x1xf32>
      %59 = vector.extract %58[0, 0, 0] : f32 from vector<1x1x1xf32>
      %c0_37 = arith.constant 0 : index
      %c0_38 = arith.constant 0 : index
      %60 = vector.load %arg6[%c0_37, %c0_38] : memref<2x128xf32, #tpu.memory_space<vmem>>, vector<2x128xf32>
      %61 = vector.shape_cast %60 : vector<2x128xf32> to vector<1x2x128xf32>
      %cst_39 = arith.constant dense<0.000000e+00> : vector<1xf32>
      %62 = vector.multi_reduction <add>, %61, %cst_39 [1, 2] : vector<1x2x128xf32> to vector<1xf32>
      %63 = vector.shape_cast %62 : vector<1xf32> to vector<1x1x1xf32>
      %64 = vector.extract %63[0, 0, 0] : f32 from vector<1x1x1xf32>
      %cst_40 = arith.constant 2.000000e+00 : f32
      %65 = arith.mulf %cst_40, %59 : f32
      %cst_41 = arith.constant 1.000000e+00 : f32
      %66 = arith.addf %65, %cst_41 : f32
      %cst_42 = arith.constant 1.000000e+00 : f32
      %67 = arith.addf %64, %cst_42 : f32
      %68 = arith.divf %66, %67 : f32
      %cst_43 = arith.constant 1.000000e+00 : f32
      %69 = arith.subf %cst_43, %68 : f32
      %c0_44 = arith.constant 0 : index
      %c0_45 = arith.constant 0 : index
      %70 = vector.load %arg7[%c0_44, %c0_45] : memref<2x128xf32, #tpu.memory_space<vmem>>, vector<2x128xf32>
      %71 = vector.shape_cast %70 : vector<2x128xf32> to vector<1x2x128xf32>
      %cst_46 = arith.constant dense<0.000000e+00> : vector<1xf32>
      %72 = vector.multi_reduction <add>, %71, %cst_46 [1, 2] : vector<1x2x128xf32> to vector<1xf32>
      %73 = vector.shape_cast %72 : vector<1xf32> to vector<1x1x1xf32>
      %74 = vector.extract %73[0, 0, 0] : f32 from vector<1x1x1xf32>
      %cst_47 = arith.constant 0.00393700786 : f32
      %75 = arith.mulf %74, %cst_47 : f32
      %76 = arith.addf %54, %69 : f32
      %cst_48 = arith.constant 1.000000e-01 : f32
      %77 = arith.mulf %cst_48, %75 : f32
      %78 = arith.addf %76, %77 : f32
      %c0_49 = arith.constant 0 : index
      %c0_50 = arith.constant 0 : index
      %79 = memref.load %arg3[%c0_49, %c0_50] : memref<1x1xf32, #tpu.memory_space<smem>>
      memref.store %78, %arg3[%c0_49, %c0_50] : memref<1x1xf32, #tpu.memory_space<smem>>
    } else {
    }
    return
  }
  func.func @transform_0(%arg0: i32) -> (i32, i32) {
    %c0_i32 = arith.constant 0 : i32
    %c0_i32_0 = arith.constant 0 : i32
    return %c0_i32, %arg0 : i32, i32
  }
  func.func @transform_1(%arg0: i32) -> (i32, i32) {
    %c0_i32 = arith.constant 0 : i32
    %c0_i32_0 = arith.constant 0 : i32
    return %c0_i32, %arg0 : i32, i32
  }
  func.func @transform_2(%arg0: i32) -> (i32, i32) {
    %c0_i32 = arith.constant 0 : i32
    %c0_i32_0 = arith.constant 0 : i32
    %c0_i32_1 = arith.constant 0 : i32
    return %c0_i32, %c0_i32_0 : i32, i32
  }
}

</mosaic_0001>

<bundles_post_ra>
// kernel: tpu_custom_call.1
= control target key start
LH: loop header
LB: loop body
LE: loop exit
PB: predicated region body
PF: predicated region fallthrough
CT: control target
= control target key end

     0   :  { %7 = vsyncpa [#allocation8], 0  ;;  %s330_s0 = inlined_call_operand.hbm [shape: f32[2,128], index: 0, kind: input, shape index: {}]   ;;  %s331_s1 = inlined_call_operand.hbm [shape: f32[2,128], index: 1, kind: input, shape index: {}]   ;;  %s332_s2 = inlined_call_operand.hbm [shape: f32[1,1], index: 2, kind: output, shape index: {}]  }
   0x1   :  { %8 = vsyncpa [#allocation11], 0 }
   0x2   :  { %9 = vsyncpa [#allocation9], 0  ;;  %s269_s9 = smov [#allocation7]   ;;  %s270_s11 = smov [#allocation10]  }
   0x3   :  { %s16_s10 = sshll.u32 %s269_s9, 4  ;;  %s26_s12 = sshll.u32 %s270_s11, 4  ;;  %s17_s10 = int_to_ptr.vmem [resolvable:$true] %s16_s10  ;;  %s27_s12 = int_to_ptr.vmem [resolvable:$true] %s26_s12 }
   0x4   :  { %s209_s15 = scalar_lea.hbm %s330_s0, 32 }
   0x5   :  { %p210_p0 = scmp.ne.s32.totalorder %s330_s0, %s209_s15  ;;  %p213_p1 = scmp.lt.u32.totalorder %s209_s15, %s330_s0 }
   0x7   :  { %p215_p2 = pnand %p213_p1, %p210_p0 }
   0x9   :  { %218 = shalt.err (!%p215_p2)
}
   0xa   :  { %s219_s20 = scalar_lea.vmem %s17_s10, 32  ;;  %p224_p4 = scmp.lt.s32.totalorder %s17_s10, %s17_s10 }
   0xb   :  { %p220_p3 = scmp.ne.s32.totalorder %s17_s10, %s219_s20  ;;  %p225_p5 = scmp.lt.s32.totalorder %s219_s20, %s219_s20 }
   0xd   :  { %p226_p6 = por %p225_p5, %p224_p4 }
   0xf   :  { %p227_p7 = pnand %p226_p6, %p220_p3 }
  0x11   :  { %230 = shalt.err (!%p227_p7)
}
  0x12   :  { %19 = dma.hbm_to_vmem [thread:$0]  %s330_s0, 32, %s17_s10, [#allocation8]  }
  0x13   :  { %s231_s25 = scalar_lea.hbm %s331_s1, 32 }
  0x14   :  { %p232_p8 = scmp.ne.s32.totalorder %s331_s1, %s231_s25  ;;  %p235_p9 = scmp.lt.u32.totalorder %s231_s25, %s331_s1 }
  0x16   :  { %p237_p10 = pnand %p235_p9, %p232_p8 }
  0x18   :  { %240 = shalt.err (!%p237_p10)
}
  0x19   :  { %s241_s30 = scalar_lea.vmem %s27_s12, 32  ;;  %p246_p12 = scmp.lt.s32.totalorder %s27_s12, %s27_s12 }
  0x1a   :  { %p242_p11 = scmp.ne.s32.totalorder %s27_s12, %s241_s30  ;;  %p247_p13 = scmp.lt.s32.totalorder %s241_s30, %s241_s30 }
  0x1c   :  { %p248_p0 = por %p247_p13, %p246_p12 }
  0x1e   :  { %p249_p1 = pnand %p248_p0, %p242_p11 }
  0x20   :  { %252 = shalt.err (!%p249_p1)
}
  0x21   :  { %29 = dma.hbm_to_vmem [thread:$0]  %s331_s1, 32, %s27_s12, [#allocation11]  }
  0x22   :  { %263 = dma.done.wait [#allocation8], 32  }
  0x23   :  { %264 = vsyncadd [#allocation8], 4294967264 }
  0x24   :  { %265 = dma.done.wait [#allocation11], 32  }
  0x25   :  { %266 = vsyncadd [#allocation11], 4294967264  ;;  %v271_v0 = vmov 0.0   ;;  %v44_v1 = vld [vmem:[#allocation7] sm:$0x3]  ;;  %s272_s4 = smov 1  }
  0x26   :  { %40 = vst [vmem:[#allocation2] sm:$0x3] %v271_v0  ;;  %41 = vst [vmem:[#allocation3] sm:$0x3] %v271_v0  ;;  %82 = vrot.lane.b32.xlu0 %v44_v1, %s272_s4  ;;  %v46_v2 = vand.u32 2147483647, %v44_v1 }
  0x27   :  { %42 = vst [vmem:[#allocation4] sm:$0x3] %v271_v0  ;;  %43 = vst [vmem:[#allocation5] sm:$0x3] %v271_v0  ;;  %v45_v8 = vld [vmem:[#allocation10] sm:$0x3] }
  0x28   :  { %v47_v3 = vsub.f32 0.0, %v46_v2  ;;  %v59_v11 = vmax.f32 %v44_v1, 0.0  ;;  %v60_v12 = vmul.f32 %v45_v8, %v44_v1  ;;  %vm66_vm1 = vcmp.ge.f32.partialorder %v44_v1, 0.0  ;;  %s273_s1 = smov 127   ;;  %s253_s22 = scalar_lea.hbm %s332_s2, 16 }
  0x29   :  { %vm111_vm2 = vcmask 1041408   ;;  %vm92_vm3 = vcmask 1033216   ;;  %p254_p2 = scmp.ne.s32.totalorder %s332_s2, %s253_s22  ;;  %p257_p3 = scmp.lt.u32.totalorder %s253_s22, %s332_s2 }
  0x2a   :  { %v48_v4 = vmul.f32 1.442695, %v47_v3  ;;  %v61_v15 = vsub.f32 %v59_v11, %v60_v12 }
  0x2b   :  { %p259_p4 = pnand %p257_p3, %p254_p2 }
  0x2c   :  { %201 = vpow2.f32 %v48_v4 }
  0x2d   :  { %v69_v20 = vld [vmem:[#allocation2] sm:$0x3]  ;;  %v72_v23 = vld [vmem:[#allocation3] sm:$0x3] }
  0x2e   :  { %v76_v24 = vld [vmem:[#allocation4] sm:$0x3]  ;;  %v80_v53 = vld [vmem:[#allocation5] sm:$0x3] }
  0x36   :  { %v202_v5 = vpop.eup %201 }
  0x37   :  { %v50_v6 = vadd.f32 1.0, %v202_v5  ;;  %v53_v7 = vmul.f32 -0.5, %v202_v5  ;;  %v56_v10 = vand.u32 2147483647, %v202_v5 }
  0x39   :  { %203 = vlog2.f32 %v50_v6  ;;  %v54_v9 = vadd.f32 1.0, %v53_v7  ;;  %vm57_vm0 = vcmp.lt.f32.partialorder %v56_v10, 0.0004427343 }
  0x3a   :  { %205 = vrcp.f32 %v50_v6 }
  0x3b   :  { %v55_v13 = vmul.f32 %v202_v5, %v54_v9 }
  0x43   :  { %v204_v14 = vpop.eup %203 }
  0x44   :  { %v206_v16 = vpop.eup %205  ;;  %v52_v17 = vmul.f32 0.6931472, %v204_v14 }
  0x45   :  { %v67_v18 = vmul.f32 %v206_v16, %v202_v5 }
  0x46   :  { %v58_v19 = vsel %vm57_vm0, %v55_v13, %v52_v17 }
  0x47   :  { %v62_v21 = vadd.f32 %v61_v15, %v58_v19  ;;  %v68_v22 = vsel %vm66_vm1, %v206_v16, %v67_v18 }
  0x48   :  { %v73_v25 = vmul.f32 %v68_v22, %v45_v8  ;;  %v77_v26 = vadd.f32 %v68_v22, %v45_v8 }
  0x49   :  { %v70_v27 = vadd.f32 %v69_v20, %v62_v21 }
  0x4a   :  { %v74_v28 = vadd.f32 %v73_v25, %v72_v23  ;;  %v78_v29 = vadd.f32 %v77_v26, %v76_v24 }
  0x4b   :  { %71 = vst [vmem:[#allocation2] sm:$0x3] %v70_v27 }
  0x4c   :  { %75 = vst [vmem:[#allocation3] sm:$0x3] %v74_v28  ;;  %79 = vst [vmem:[#allocation4] sm:$0x3] %v78_v29 }
  0x52   :  { %v110_v30 = vld [vmem:[#allocation2] sm:$0x3] }
  0x53   :  { %v112_v31 = vsel %vm111_vm2, %v110_v30, 0.0  ;;  %v123_v32 = vld [vmem:[#allocation3] sm:$0x3]  ;;  %v134_v37 = vld [vmem:[#allocation4] sm:$0x3] }
  0x54   :  { %113 = vadd.xlane.f32.xlu1 %v112_v31  ;;  %v124_v33 = vsel %vm111_vm2, %v123_v32, 0.0  ;;  %v135_v38 = vsel %vm111_vm2, %v134_v37, 0.0 }
  0x58   :  { %125 = vadd.xlane.f32.xlu1 %v124_v33 }
  0x98   :  { %v83_v34 = vpop.permute.xlu0 %82 }
  0x99   :  { %v85_v35 = vsub.f32 %v44_v1, %v83_v34 }
  0x9b   :  { %v86_v36 = vand.u32 2147483647, %v85_v35 }
  0x9d   :  { %88 = vrot.lane.b32.xlu0 %v86_v36, %s273_s1 }
  0xbc   :  { %136 = vadd.xlane.f32.xlu0 %v135_v38 }
  0xe1   :  { %v114_v39 = vpop.xlane.xlu1 %113 }
  0xe2   :  { %v115_v40 = vrot.slane %v114_v39, 4 }
  0xe4   :  { %v116_v41 = vadd.f32 %v115_v40, %v114_v39 }
  0xe5   :  { %v126_v42 = vpop.xlane.xlu1 %125 }
  0xe6   :  { %v117_v43 = vrot.slane %v116_v41, 2  ;;  %v127_v44 = vrot.slane %v126_v42, 4 }
  0xe8   :  { %v128_v45 = vadd.f32 %v127_v44, %v126_v42  ;;  %v118_v46 = vadd.f32 %v117_v43, %v116_v41 }
  0xea   :  { %v129_v47 = vrot.slane %v128_v45, 2  ;;  %v119_v48 = vrot.slane %v118_v46, 1 }
  0xec   :  { %v120_v49 = vadd.f32 %v119_v48, %v118_v46  ;;  %v130_v50 = vadd.f32 %v129_v47, %v128_v45 }
  0xee   :  { %185 = vpush %v120_v49  ;;  %v131_v51 = vrot.slane %v130_v50, 1 }
  0xf0   :  { %v132_v52 = vadd.f32 %v131_v51, %v130_v50 }
  0xf2   :  { %187 = vpush %v132_v52 }
 0x10f   :  { %v89_v54 = vpop.permute.xlu0 %88 }
 0x110   :  { %v91_v55 = vadd.f32 %v89_v54, %v80_v53 }
 0x112   :  { %93 = vst.msk [vmem:[#allocation5] sm:$0x3] %vm92_vm3, %v91_v55 }
 0x119   :  { %v153_v56 = vld [vmem:[#allocation5] sm:$0x3] }
 0x11a   :  { %v154_v57 = vsel %vm111_vm2, %v153_v56, 0.0 }
 0x11b   :  { %155 = vadd.xlane.f32.xlu1 %v154_v57 }
 0x11f   :  { %s186_s5 = spop %185 }
 0x120   :  { %s122_s14 = smul.f32 0.00390625, %s186_s5 }
 0x123   :  { %s188_s6 = spop %187 }
 0x124   :  { %s145_s9 = smul.f32 2.0, %s188_s6 }
 0x126   :  { %s146_s11 = sadd.f32 1.0, %s145_s9 }
 0x149   :  { %v137_v58 = vpop.xlane.xlu0 %136 }
 0x14a   :  { %v138_v59 = vrot.slane %v137_v58, 4 }
 0x14c   :  { %v139_v60 = vadd.f32 %v138_v59, %v137_v58 }
 0x14e   :  { %v140_v61 = vrot.slane %v139_v60, 2 }
 0x150   :  { %v141_v62 = vadd.f32 %v140_v61, %v139_v60 }
 0x152   :  { %v142_v63 = vrot.slane %v141_v62, 1 }
 0x154   :  { %v143_v0 = vadd.f32 %v142_v63, %v141_v62 }
 0x156   :  { %189 = vpush %v143_v0 }
 0x187   :  { %s190_s7 = spop %189 }
 0x188   :  { %s147_s8 = sadd.f32 1.0, %s190_s7 }
 0x18a   :  { %v148_v1 = vstv %s147_s8 }
 0x18b   :  { %207 = vrcp.f32 %v148_v1 }
 0x195   :  { %v208_v2 = vpop.eup %207 }
 0x196   :  { %191 = vpush %v208_v2 }
 0x1a8   :  { %v156_v3 = vpop.xlane.xlu1 %155 }
 0x1a9   :  { %v157_v4 = vrot.slane %v156_v3, 4 }
 0x1ab   :  { %v158_v5 = vadd.f32 %v157_v4, %v156_v3 }
 0x1ad   :  { %v159_v6 = vrot.slane %v158_v5, 2 }
 0x1af   :  { %v160_v7 = vadd.f32 %v159_v6, %v158_v5 }
 0x1b1   :  { %v161_v8 = vrot.slane %v160_v7, 1 }
 0x1b3   :  { %v162_v9 = vadd.f32 %v161_v8, %v160_v7 }
 0x1b5   :  { %193 = vpush %v162_v9 }
 0x1c7   :  { %s192_s10 = spop %191 }
 0x1c8   :  { %s151_s12 = smul.f32 %s192_s10, %s146_s11 }
 0x1ca   :  { %s152_s13 = ssub.f32 1.0, %s151_s12 }
 0x1cc   :  { %s165_s17 = sadd.f32 %s152_s13, %s122_s14 }
 0x1e6   :  { %s194_s15 = spop %193 }
 0x1e7   :  { %s164_s16 = smul.f32 0.003937008, %s194_s15 }
 0x1e9   :  { %s166_s18 = smul.f32 0.1, %s164_s16 }
 0x1eb   :  { %s167_s19 = sadd.f32 %s166_s18, %s165_s17 }
 0x1ed   :  { %169 = sst [smem:[#allocation12]] %s167_s19 }
 0x1ee   :  { %262 = shalt.err (!%p259_p4)
}
 0x1ef   :  { %s274_s27 = smov [#allocation12]  }
 0x1f0   :  { %177 = dma.smem_to_hbm %s274_s27, 16, %s332_s2, [#allocation9]  }
 0x1f1   :  { %267 = dma.done.wait [#allocation9], 16  }
 0x1f2   :  { %268 = vsyncadd [#allocation9], 4294967280 }
 0x1f3   :  { %181 = sfence }
 0x1f4   :  { %182 = vsyncpa [#allocation8], 1 }
 0x1f5   :  { %183 = vsyncpa [#allocation11], 1 }
 0x1f6   :  { %184 = vsyncpa [#allocation9], 1 }

</bundles_post_ra>
